<compile_context>
chip_gen: v5e
topology: v5e:2x2
jax: 0.10.0
libtpu: 0.0.40
codegen_flags: <defaults>
</compile_context>

<pallas_src>
import functools

import jax
import jax.numpy as jnp
from jax.experimental import pallas as pl
from jax.experimental.pallas import tpu as pltpu


def _round_up(x, m):
    return ((x + m - 1) // m) * m


def _fused_mlp_kernel(x_ref, *refs, num_layers):
    """Fused MLP on one batch tile: (Linear + ReLU) x (L-1), then Linear.

    refs = (w0, b0, w1, b1, ..., w_{L-1}, b_{L-1}, o_ref); all weights/biases live in VMEM.
    """
    o_ref = refs[-1]
    wb_refs = refs[:-1]

    net = x_ref[...].astype(jnp.float32)
    for i in range(num_layers):
        w = wb_refs[2 * i][...]          # (K_i, N_i), resident in VMEM
        b = wb_refs[2 * i + 1][...]      # (1, N_i), broadcasts over batch (loaded once/layer)
        # MXU matmul, f32 accumulation. If weights are bf16 (v6e/v7x), cast activations
        # so the dot runs on the native bf16 MXU path.
        y = jnp.dot(net.astype(w.dtype), w, preferred_element_type=jnp.float32)
        y = y + b.astype(jnp.float32)    # bias add in f32 (VPU)
        if i < num_layers - 1:
            y = jnp.maximum(y, 0.0)      # ReLU in f32 (VPU)
        net = y
    o_ref[...] = net.astype(o_ref.dtype)


def mlp_forward(x, params, *, block_m=512, interpret=False):
    """Fused forward pass. x: (M, in_channels); params: list of (w_t (K,N), b (1,N))."""
    M, K = x.shape
    num_layers = len(params)
    n_out = params[-1][0].shape[1]
    out_dtype = x.dtype

    # Lane-dense output: pad the final layer's output width to a multiple of 128 with
    # zero columns; slice the pad off after the kernel.
    n_pad = _round_up(n_out, 128)
    w_last, b_last = params[-1]
    if n_pad != n_out:
        w_last = jnp.pad(w_last, ((0, 0), (0, n_pad - n_out)))
        b_last = jnp.pad(b_last, ((0, 0), (0, n_pad - n_out)))
    padded_params = list(params[:-1]) + [(w_last, b_last)]

    # Tile only the batch dimension; keep it sublane-aligned (multiple of 8) and pad M
    # up to a whole number of tiles (pad rows are sliced off afterwards).
    tm = min(_round_up(M, 8), block_m)
    m_pad = _round_up(M, tm)
    x_p = jnp.pad(x, ((0, m_pad - M), (0, 0))) if m_pad != M else x

    in_specs = [pl.BlockSpec((tm, K), lambda i: (i, 0))]
    flat_wb = []
    for (w_t, b) in padded_params:
        kin, nout = w_t.shape
        # Full-array blocks; same (0,0) block at every grid step -> pinned in VMEM,
        # never re-DMA'd per batch tile.
        in_specs.append(pl.BlockSpec((kin, nout), lambda i: (0, 0)))
        in_specs.append(pl.BlockSpec((1, nout), lambda i: (0, 0)))
        flat_wb.extend((w_t, b))

    out = pl.pallas_call(
        functools.partial(_fused_mlp_kernel, num_layers=num_layers),
        out_shape=jax.ShapeDtypeStruct((m_pad, n_pad), out_dtype),
        grid=(m_pad // tm,),
        in_specs=in_specs,
        out_specs=pl.BlockSpec((tm, n_pad), lambda i: (i, 0)),
        compiler_params=pltpu.CompilerParams(
            # Batch tiles are independent -> shard across TensorCores (v7x megacore).
            dimension_semantics=("parallel",),
        ),
        interpret=interpret,
    )(x_p, *flat_wb)
    return out[:M, :n_out]


def init_mlp_params(key, in_channels, layer_dim, dtype=jnp.float32):
    """Mimics nn.Linear's uniform(-1/sqrt(fan_in), 1/sqrt(fan_in)) init.

    Returns list of (w_t, b): w_t (fan_in, fan_out), b (1, fan_out), cast to `dtype`.
    """
    params = []
    fan_in = in_channels
    for fan_out in layer_dim:
        key, kw, kb = jax.random.split(key, 3)
        bound = 1.0 / jnp.sqrt(jnp.float32(fan_in))
        w_t = jax.random.uniform(kw, (fan_in, fan_out), jnp.float32, -bound, bound)
        b = jax.random.uniform(kb, (1, fan_out), jnp.float32, -bound, bound)
        params.append((w_t.astype(dtype), b.astype(dtype)))
        fan_in = fan_out
    return params


def mlp_forward_ref(x, params):
    """Pure-JAX reference (mirrors the kernel's dtype handling: dot in weight dtype, f32 acc)."""
    net = x.astype(jnp.float32)
    n = len(params)
    for i, (w_t, b) in enumerate(params):
        net = jnp.dot(net.astype(w_t.dtype), w_t, preferred_element_type=jnp.float32)
        net = net + b.astype(jnp.float32)
        if i < n - 1:
            net = jnp.maximum(net, 0.0)
    return net


if __name__ == "__main__":
    key = jax.random.PRNGKey(0)
    in_channels = 32
    layer_dim = [64, 32, 16]  # two hidden Linear+ReLU layers, final Linear

    # --- f32 weights, single batch tile ---
    batch = 8
    k_x, k_p, k_x2 = jax.random.split(key, 3)
    x = jax.random.normal(k_x, (batch, in_channels), jnp.float32)
    params_f32 = init_mlp_params(k_p, in_channels, layer_dim, dtype=jnp.float32)

    out = jax.block_until_ready(mlp_forward(x, params_f32))
    ref = mlp_forward_ref(x, params_f32)
    assert out.shape == (batch, layer_dim[-1])
    assert jnp.allclose(out, ref, atol=1e-5, rtol=1e-5)

    # --- bf16 weights (v6e/v7x MXU path), multiple batch tiles + row padding ---
    batch2 = 100
    x2 = jax.random.normal(k_x2, (batch2, in_channels), jnp.float32)
    params_bf16 = init_mlp_params(k_p, in_channels, layer_dim, dtype=jnp.bfloat16)

    out2 = jax.block_until_ready(mlp_forward(x2, params_bf16, block_m=64))
    ref2 = mlp_forward_ref(x2, params_bf16)
    assert out2.shape == (batch2, layer_dim[-1])
    assert jnp.allclose(out2, ref2, atol=1e-2, rtol=1e-2)

    print("KERNEL_OK")
</pallas_src>

<mosaic_0001>
module attributes {stable_mosaic.version = 11 : i64} {
  func.func @_fused_mlp_kernel(%arg0: i32, %arg1: memref<8x32xf32, #tpu.memory_space<vmem>>, %arg2: memref<32x64xf32, #tpu.memory_space<vmem>>, %arg3: memref<1x64xf32, #tpu.memory_space<vmem>>, %arg4: memref<64x32xf32, #tpu.memory_space<vmem>>, %arg5: memref<1x32xf32, #tpu.memory_space<vmem>>, %arg6: memref<32x128xf32, #tpu.memory_space<vmem>>, %arg7: memref<1x128xf32, #tpu.memory_space<vmem>>, %arg8: memref<8x128xf32, #tpu.memory_space<vmem>>) attributes {dimension_semantics = [#tpu.dimension_semantics<parallel>], iteration_bounds = array<i64: 1>, scalar_prefetch = 0 : i64, scratch_operands = 0 : i64, tpu.core_type = #tpu.core_type<tc>, window_params = [{transform_indices = @transform_0, window_bounds = array<i64: 8, 32>}, {pipeline_mode = #tpu.pipeline_mode<synchronous>, transform_indices = @transform_1, window_bounds = array<i64: 32, 64>}, {pipeline_mode = #tpu.pipeline_mode<synchronous>, transform_indices = @transform_2, window_bounds = array<i64: 1, 64>}, {pipeline_mode = #tpu.pipeline_mode<synchronous>, transform_indices = @transform_3, window_bounds = array<i64: 64, 32>}, {pipeline_mode = #tpu.pipeline_mode<synchronous>, transform_indices = @transform_4, window_bounds = array<i64: 1, 32>}, {pipeline_mode = #tpu.pipeline_mode<synchronous>, transform_indices = @transform_5, window_bounds = array<i64: 32, 128>}, {pipeline_mode = #tpu.pipeline_mode<synchronous>, transform_indices = @transform_6, window_bounds = array<i64: 1, 128>}, {transform_indices = @transform_7, window_bounds = array<i64: 8, 128>}]} {
    %c0 = arith.constant 0 : index
    %c0_0 = arith.constant 0 : index
    %0 = vector.load %arg1[%c0, %c0_0] : memref<8x32xf32, #tpu.memory_space<vmem>>, vector<8x32xf32>
    %c0_1 = arith.constant 0 : index
    %c0_2 = arith.constant 0 : index
    %1 = vector.load %arg2[%c0_1, %c0_2] : memref<32x64xf32, #tpu.memory_space<vmem>>, vector<32x64xf32>
    %c0_3 = arith.constant 0 : index
    %c0_4 = arith.constant 0 : index
    %2 = vector.load %arg3[%c0_3, %c0_4] : memref<1x64xf32, #tpu.memory_space<vmem>>, vector<1x64xf32>
    %cst = arith.constant dense<0.000000e+00> : vector<8x64xf32>
    %3 = tpu.matmul %0, %1, %cst {dimension_numbers = #tpu.dot_dimension_numbers<[1], [0], [0], [1], [0, 0, 1, 1], [], []>} : vector<8x32xf32>, vector<32x64xf32>, vector<8x64xf32> -> vector<8x64xf32>
    %4 = vector.broadcast %2 : vector<1x64xf32> to vector<8x64xf32>
    %5 = arith.addf %3, %4 : vector<8x64xf32>
    %cst_5 = arith.constant 0.000000e+00 : f32
    %6 = vector.broadcast %cst_5 : f32 to vector<8x64xf32>
    %7 = arith.maximumf %5, %6 : vector<8x64xf32>
    %c0_6 = arith.constant 0 : index
    %c0_7 = arith.constant 0 : index
    %8 = vector.load %arg4[%c0_6, %c0_7] : memref<64x32xf32, #tpu.memory_space<vmem>>, vector<64x32xf32>
    %c0_8 = arith.constant 0 : index
    %c0_9 = arith.constant 0 : index
    %9 = vector.load %arg5[%c0_8, %c0_9] : memref<1x32xf32, #tpu.memory_space<vmem>>, vector<1x32xf32>
    %cst_10 = arith.constant dense<0.000000e+00> : vector<8x32xf32>
    %10 = tpu.matmul %7, %8, %cst_10 {dimension_numbers = #tpu.dot_dimension_numbers<[1], [0], [0], [1], [0, 0, 1, 1], [], []>} : vector<8x64xf32>, vector<64x32xf32>, vector<8x32xf32> -> vector<8x32xf32>
    %11 = vector.broadcast %9 : vector<1x32xf32> to vector<8x32xf32>
    %12 = arith.addf %10, %11 : vector<8x32xf32>
    %cst_11 = arith.constant 0.000000e+00 : f32
    %13 = vector.broadcast %cst_11 : f32 to vector<8x32xf32>
    %14 = arith.maximumf %12, %13 : vector<8x32xf32>
    %c0_12 = arith.constant 0 : index
    %c0_13 = arith.constant 0 : index
    %15 = vector.load %arg6[%c0_12, %c0_13] : memref<32x128xf32, #tpu.memory_space<vmem>>, vector<32x128xf32>
    %c0_14 = arith.constant 0 : index
    %c0_15 = arith.constant 0 : index
    %16 = vector.load %arg7[%c0_14, %c0_15] : memref<1x128xf32, #tpu.memory_space<vmem>>, vector<1x128xf32>
    %cst_16 = arith.constant dense<0.000000e+00> : vector<8x128xf32>
    %17 = tpu.matmul %14, %15, %cst_16 {dimension_numbers = #tpu.dot_dimension_numbers<[1], [0], [0], [1], [0, 0, 1, 1], [], []>} : vector<8x32xf32>, vector<32x128xf32>, vector<8x128xf32> -> vector<8x128xf32>
    %18 = vector.broadcast %16 : vector<1x128xf32> to vector<8x128xf32>
    %19 = arith.addf %17, %18 : vector<8x128xf32>
    %c0_17 = arith.constant 0 : index
    %c0_18 = arith.constant 0 : index
    %20 = vector.load %arg8[%c0_17, %c0_18] : memref<8x128xf32, #tpu.memory_space<vmem>>, vector<8x128xf32>
    tpu.vector_store %arg8[%c0_17, %c0_18], %19 {strides = array<i32>} : memref<8x128xf32, #tpu.memory_space<vmem>>, vector<8x128xf32>,
    return
  }
  func.func @transform_0(%arg0: i32) -> (i32, i32) {
    %c0_i32 = arith.constant 0 : i32
    %c0_i32_0 = arith.constant 0 : i32
    return %arg0, %c0_i32 : i32, i32
  }
  func.func @transform_1(%arg0: i32) -> (i32, i32) {
    %c0_i32 = arith.constant 0 : i32
    %c0_i32_0 = arith.constant 0 : i32
    %c0_i32_1 = arith.constant 0 : i32
    return %c0_i32, %c0_i32_0 : i32, i32
  }
  func.func @transform_2(%arg0: i32) -> (i32, i32) {
    %c0_i32 = arith.constant 0 : i32
    %c0_i32_0 = arith.constant 0 : i32
    %c0_i32_1 = arith.constant 0 : i32
    return %c0_i32, %c0_i32_0 : i32, i32
  }
  func.func @transform_3(%arg0: i32) -> (i32, i32) {
    %c0_i32 = arith.constant 0 : i32
    %c0_i32_0 = arith.constant 0 : i32
    %c0_i32_1 = arith.constant 0 : i32
    return %c0_i32, %c0_i32_0 : i32, i32
  }
  func.func @transform_4(%arg0: i32) -> (i32, i32) {
    %c0_i32 = arith.constant 0 : i32
    %c0_i32_0 = arith.constant 0 : i32
    %c0_i32_1 = arith.constant 0 : i32
    return %c0_i32, %c0_i32_0 : i32, i32
  }
  func.func @transform_5(%arg0: i32) -> (i32, i32) {
    %c0_i32 = arith.constant 0 : i32
    %c0_i32_0 = arith.constant 0 : i32
    %c0_i32_1 = arith.constant 0 : i32
    return %c0_i32, %c0_i32_0 : i32, i32
  }
  func.func @transform_6(%arg0: i32) -> (i32, i32) {
    %c0_i32 = arith.constant 0 : i32
    %c0_i32_0 = arith.constant 0 : i32
    %c0_i32_1 = arith.constant 0 : i32
    return %c0_i32, %c0_i32_0 : i32, i32
  }
  func.func @transform_7(%arg0: i32) -> (i32, i32) {
    %c0_i32 = arith.constant 0 : i32
    %c0_i32_0 = arith.constant 0 : i32
    return %arg0, %c0_i32 : i32, i32
  }
}

</mosaic_0001>

<bundles_post_ra>
// kernel: tpu_custom_call.1
= control target key start
LH: loop header
LB: loop body
LE: loop exit
PB: predicated region body
PF: predicated region fallthrough
CT: control target
= control target key end

     0   :  { %s285_s0 = inlined_call_operand.vmem [shape: f32[8,32], index: 0, kind: input, shape index: {}]   ;;  %s286_s1 = inlined_call_operand.vmem [shape: f32[32,64], index: 1, kind: input, shape index: {}]   ;;  %s287_s2 = inlined_call_operand.vmem [shape: f32[1,64], index: 2, kind: input, shape index: {}]   ;;  %s288_s3 = inlined_call_operand.vmem [shape: f32[64,32], index: 3, kind: input, shape index: {}]   ;;  %s289_s4 = inlined_call_operand.vmem [shape: f32[1,32], index: 4, kind: input, shape index: {}]   ;;  %s290_s5 = inlined_call_operand.vmem [shape: f32[32,128], index: 5, kind: input, shape index: {}]   ;;  %s291_s6 = inlined_call_operand.vmem [shape: f32[1,128], index: 6, kind: input, shape index: {}]   ;;  %s292_s7 = inlined_call_operand.hbm [shape: f32[8,128], index: 7, kind: output, shape index: {}]  }
   0x1   :  { %v31_v0 = vld [vmem:[%s286_s1 + $0x18] sm:$0xff]  ;;  %v30_v1 = vld [vmem:[%s286_s1 + $0x10] sm:$0xff]  ;;  %v29_v3 = vld [vmem:[%s286_s1 + $0x8] sm:$0xff] }
   0x2   :  { %52 = vmatpush.msra.mxu0 %v31_v0  ;;  %v68_v2 = vld [vmem:[%s288_s3 + $0x38] sm:$0xff]  ;;  %v67_v4 = vld [vmem:[%s288_s3 + $0x30] sm:$0xff]  ;;  %v28_v5 = vld [vmem:[%s286_s1] sm:$0xff] }
   0x3   :  { %85 = vmatpush.msra.mxu1 %v68_v2  ;;  %v66_v6 = vld [vmem:[%s288_s3 + $0x28] sm:$0xff] }
   0x4   :  { %53 = vmatpush.msra.mxu0 %v30_v1 }
   0x5   :  { %86 = vmatpush.msra.mxu1 %v67_v4 }
   0x6   :  { %12 = vsyncpa [#allocation3], 0  ;;  %54 = vmatpush.msra.mxu0 %v29_v3  ;;  %v27_v7 = vld [vmem:[%s285_s0] sm:$0xff]  ;;  %vm36_vm0 = vcmask 261120   ;;  %v64_v9 = vld [vmem:[%s288_s3 + $0x18] sm:$0xff]  ;;  %vm73_vm1 = vcmask 523264  }
   0x7   :  { %v65_v8 = vld [vmem:[%s288_s3 + $0x20] sm:$0xff]  ;;  %87 = vmatpush.msra.mxu1 %v66_v6  ;;  %v63_v10 = vld [vmem:[%s288_s3 + $0x10] sm:$0xff]  ;;  %v62_v11 = vld [vmem:[%s288_s3 + $0x8] sm:$0xff]  ;;  %s179_s14 = smov [#allocation2]  }
   0x8   :  { %55 = vmatpush.msra.mxu0 %v28_v5  ;;  %v61_v12 = vld [vmem:[%s288_s3] sm:$0xff]  ;;  %v101_v13 = vld [vmem:[%s290_s5 + $0x18] sm:$0xff]  ;;  %v100_v18 = vld [vmem:[%s290_s5 + $0x10] sm:$0xff]  ;;  %s135_s15 = sshll.u32 %s179_s14, 4  ;;  %s136_s15 = int_to_ptr.vmem [resolvable:$true] %s135_s15 }
   0x9   :  { %146 = vmatmul.msk.f32.vlgmr.msra.gmra.mxu0 %vm36_vm0, %v27_v7  ;;  %88 = vmatpush.msra.mxu1 %v65_v8  ;;  %v150_v14 = vld [vmem:[%s287_s2] ss:$0 sm:$0xff]  ;;  %v99_v19 = vld [vmem:[%s290_s5 + $0x8] sm:$0xff] }
   0xa   :  { %121 = vmatpush.msra.mxu2 %v101_v13  ;;  %v98_v20 = vld [vmem:[%s290_s5] sm:$0xff]  ;;  %s137_s5 = sshll.u32 %s292_s7, 4  ;;  %s138_s5 = int_to_ptr.hbm [resolvable:$true] %s137_s5 }
   0xb   :  { %89 = vmatpush.msra.mxu1 %v64_v9  ;;  %v151_v21 = vld [vmem:[%s289_s4] ss:$0 sm:$0xff] }
   0xc   :  { %122 = vmatpush.msra.mxu2 %v100_v18  ;;  %v152_v25 = vld [vmem:[%s291_s6] ss:$0 sm:$0xff] }
   0xd   :  { %90 = vmatpush.msra.mxu1 %v63_v10 }
   0xe   :  { %123 = vmatpush.msra.mxu2 %v99_v19 }
   0xf   :  { %91 = vmatpush.msra.mxu1 %v62_v11 }
  0x10   :  { %124 = vmatpush.msra.mxu2 %v98_v20 }
  0x11   :  { %92 = vmatpush.msra.mxu1 %v61_v12 }
  0x86   :  { %v57_v15 = vpop.f32.mrf.mxu0 }
  0x87   :  { %v58_v16 = vadd.f32 %v150_v14, %v57_v15 }
  0x89   :  { %v60_v17 = vmax.f32 %v58_v16, 0.0 }
  0x8b   :  { %147 = vmatmul.msk.f32.vlgmr.msra.gmra.mxu1 %vm73_vm1, %v60_v17 }
 0x108   :  { %v94_v22 = vpop.f32.mrf.mxu1 }
 0x109   :  { %v95_v23 = vadd.f32 %v151_v21, %v94_v22 }
 0x10b   :  { %v97_v24 = vmax.f32 %v95_v23, 0.0 }
 0x10d   :  { %148 = vmatmul.msk.f32.vlgmr.msra.gmra.mxu2 %vm36_vm0, %v97_v24 }
 0x190   :  { %v126_v26 = vpop.f32.mrf.mxu2 }
 0x191   :  { %v127_v27 = vadd.f32 %v152_v25, %v126_v26 }
 0x193   :  { %129 = vst [vmem:[#allocation2] sm:$0xff] %v127_v27 }
 0x194   :  { %140 = dma.vmem_to_hbm [thread:$0]  %s136_s15, 128, %s138_s5, [#allocation3]  }
 0x195   :  { %177 = dma.done.wait [#allocation3], 128  }
 0x196   :  { %178 = vsyncadd [#allocation3], 4294967168 }
 0x197   :  { %145 = vsyncpa [#allocation3], 1 }

</bundles_post_ra>
